<compile_context>
chip_gen: v7x
topology: tpu7x:2x2x1
jax: 0.10.0
libtpu: 0.0.40
codegen_flags: <defaults>
</compile_context>

<pallas_src>
import jax
import jax.numpy as jnp
import numpy as np
from jax import lax
from jax.experimental import pallas as pl
from jax.experimental.pallas import tpu as pltpu


def lstm_fc_kernel(x_ref, wih_ref, whh_ref, b_ref, w1_ref, b1_ref, w2_ref, b2_ref,
                   o_ref, hs_ref):
    B, T, D = x_ref.shape
    H = whh_ref.shape[0]
    C = w2_ref.shape[1]

    # ---- input projection for all timesteps in one MXU call -----------------
    # gx[b, t, :] = x[b, t, :] @ W_ih^T + (b_ih + b_hh)   (bias hoisted out of loop)
    x_all = x_ref[...].reshape(B * T, D)                               # (B*T, D)
    gx = (jnp.dot(x_all, wih_ref[...], preferred_element_type=jnp.float32)
          + b_ref[...])                                                # (B*T, 4H)
    gx = gx.reshape(B, T, 4 * H)

    whh = whh_ref[...]                                                 # (H, 4H)

    # ---- recurrence: fully unrolled, T is small & static ---------------------
    # Only one MXU dot per step on the serial dependency chain.
    h = jnp.zeros((B, H), jnp.float32)
    c = jnp.zeros((B, H), jnp.float32)
    for t in range(T):
        gates = gx[:, t, :] + jnp.dot(h, whh,
                                      preferred_element_type=jnp.float32)  # (B, 4H)
        # Whole-tile transcendentals (2 EUP pushes), then static lane slices.
        sg = jax.nn.sigmoid(gates)
        th = jnp.tanh(gates)
        i_g = sg[:, 0 * H:1 * H]
        f_g = sg[:, 1 * H:2 * H]
        g_g = th[:, 2 * H:3 * H]
        o_g = sg[:, 3 * H:4 * H]
        c = f_g * c + i_g * g_g
        h = o_g * jnp.tanh(c)
        hs_ref[:, t, :] = h                                            # stash h_t

    # ---- FC head on all timesteps at once (2 batched matmuls, 1 store) -------
    # TODO(synk): only the default num_fc=0 head (fc1 -> relu -> fc2) is implemented;
    # the num_fc>0 branch would just add more (B*T, 20)@(20, 20) matmuls here.
    hs_all = hs_ref[...].reshape(B * T, H)                             # (B*T, H)
    z1 = jnp.maximum(
        jnp.dot(hs_all, w1_ref[...], preferred_element_type=jnp.float32)
        + b1_ref[...],
        0.0)                                                           # (B*T, 10)
    out = (jnp.dot(z1, w2_ref[...], preferred_element_type=jnp.float32)
           + b2_ref[...])                                              # (B*T, C)
    o_ref[...] = out.reshape(B, T, C).astype(o_ref.dtype)              # single store


def lstm_regressor_forward(x_btd, params):
    """x_btd: (B, T, D) float32, batch-first like PyTorch. Returns (B, T, C)."""
    B, T, D = x_btd.shape
    wih, whh, b, w1, b1, w2, b2 = params
    H = whh.shape[0]
    C = w2.shape[1]

    vmem = lambda: pl.BlockSpec(memory_space=pltpu.MemorySpace.VMEM)

    return pl.pallas_call(
        lstm_fc_kernel,
        out_shape=jax.ShapeDtypeStruct((B, T, C), jnp.float32),
        in_specs=[vmem() for _ in range(8)],     # whole arrays, VMEM-resident
        out_specs=vmem(),
        scratch_shapes=[pltpu.VMEM((B, T, H), jnp.float32)],   # h_t stash for FC head
    )(x_btd, wih, whh, b, w1, b1, w2, b2)


def init_params(key, input_dim, num_hidden, num_classes):
    """Deterministic init mirroring the module's parameter shapes (num_fc=0)."""
    D, H, C = input_dim, num_hidden, num_classes
    ks = jax.random.split(key, 7)
    bound = 1.0 / np.sqrt(H)
    u = lambda k, shape, bd: jax.random.uniform(k, shape, jnp.float32, -bd, bd)
    wih = u(ks[0], (D, 4 * H), bound)          # weight_ih_l0^T
    whh = u(ks[1], (H, 4 * H), bound)          # weight_hh_l0^T
    b = u(ks[2], (1, 4 * H), bound)            # b_ih + b_hh combined
    w1 = u(ks[3], (H, 10), 1.0 / np.sqrt(H))   # fc1 weight^T
    b1 = u(ks[4], (1, 10), 1.0 / np.sqrt(H))
    w2 = u(ks[5], (10, C), 1.0 / np.sqrt(10))  # fc2 weight^T
    b2 = u(ks[6], (1, C), 1.0 / np.sqrt(10))
    return (wih, whh, b, w1, b1, w2, b2)


def reference_forward(x_btd, params):
    """Pure-JAX reference (lax.scan LSTM + fc head), for correctness check."""
    wih, whh, b, w1, b1, w2, b2 = params
    B = x_btd.shape[0]
    H = whh.shape[0]

    def step(carry, x_t):
        h, c = carry
        gates = x_t @ wih + h @ whh + b
        i = jax.nn.sigmoid(gates[:, 0 * H:1 * H])
        f = jax.nn.sigmoid(gates[:, 1 * H:2 * H])
        g = jnp.tanh(gates[:, 2 * H:3 * H])
        o = jax.nn.sigmoid(gates[:, 3 * H:4 * H])
        c = f * c + i * g
        h = o * jnp.tanh(c)
        return (h, c), h

    h0 = jnp.zeros((B, H), jnp.float32)
    c0 = jnp.zeros((B, H), jnp.float32)
    _, hs = lax.scan(step, (h0, c0), jnp.transpose(x_btd, (1, 0, 2)))  # (T, B, H)
    on = jnp.transpose(hs, (1, 0, 2))                                  # (B, T, H)
    z = jnp.maximum(on @ w1 + b1, 0.0)
    return z @ w2 + b2


if __name__ == "__main__":
    # Small shapes consistent with the module: batch=2, seq=8, input_dim=8,
    # num_hidden=16, num_classes=2, num_fc=0.
    B, T, D, H, C = 2, 8, 8, 16, 2

    key = jax.random.PRNGKey(0)
    kx, kp = jax.random.split(key)
    x = jax.random.normal(kx, (B, T, D), jnp.float32)
    params = init_params(kp, D, H, C)

    out = lstm_regressor_forward(x, params)
    out = jax.block_until_ready(out)

    ref = jax.block_until_ready(reference_forward(x, params))
    np.testing.assert_allclose(np.asarray(out), np.asarray(ref), rtol=1e-5, atol=1e-5)
    assert out.shape == (B, T, C)

    print("KERNEL_OK")
</pallas_src>

<mosaic_0001>
module attributes {stable_mosaic.version = 11 : i64} {
  func.func @lstm_fc_kernel(%arg0: memref<2x8x8xf32, #tpu.memory_space<vmem>>, %arg1: memref<8x64xf32, #tpu.memory_space<vmem>>, %arg2: memref<16x64xf32, #tpu.memory_space<vmem>>, %arg3: memref<1x64xf32, #tpu.memory_space<vmem>>, %arg4: memref<16x10xf32, #tpu.memory_space<vmem>>, %arg5: memref<1x10xf32, #tpu.memory_space<vmem>>, %arg6: memref<10x2xf32, #tpu.memory_space<vmem>>, %arg7: memref<1x2xf32, #tpu.memory_space<vmem>>, %arg8: memref<2x8x2xf32, #tpu.memory_space<vmem>>, %arg9: memref<2x8x16xf32, #tpu.memory_space<vmem>>) attributes {dimension_semantics = [], scalar_prefetch = 0 : i64, scratch_operands = 1 : i64, tpu.core_type = #tpu.core_type<tc>} {
    %c0 = arith.constant 0 : index
    %c0_0 = arith.constant 0 : index
    %c0_1 = arith.constant 0 : index
    %0 = vector.load %arg0[%c0, %c0_0, %c0_1] : memref<2x8x8xf32, #tpu.memory_space<vmem>>, vector<2x8x8xf32>
    %1 = vector.shape_cast %0 : vector<2x8x8xf32> to vector<16x8xf32>
    %c0_2 = arith.constant 0 : index
    %c0_3 = arith.constant 0 : index
    %2 = vector.load %arg1[%c0_2, %c0_3] : memref<8x64xf32, #tpu.memory_space<vmem>>, vector<8x64xf32>
    %cst = arith.constant dense<0.000000e+00> : vector<16x64xf32>
    %3 = tpu.matmul %1, %2, %cst {dimension_numbers = #tpu.dot_dimension_numbers<[1], [0], [0], [1], [0, 0, 1, 1], [], []>} : vector<16x8xf32>, vector<8x64xf32>, vector<16x64xf32> -> vector<16x64xf32>
    %c0_4 = arith.constant 0 : index
    %c0_5 = arith.constant 0 : index
    %4 = vector.load %arg3[%c0_4, %c0_5] : memref<1x64xf32, #tpu.memory_space<vmem>>, vector<1x64xf32>
    %5 = vector.broadcast %4 : vector<1x64xf32> to vector<16x64xf32>
    %6 = arith.addf %3, %5 : vector<16x64xf32>
    %7 = vector.shape_cast %6 : vector<16x64xf32> to vector<2x8x64xf32>
    %c0_6 = arith.constant 0 : index
    %c0_7 = arith.constant 0 : index
    %8 = vector.load %arg2[%c0_6, %c0_7] : memref<16x64xf32, #tpu.memory_space<vmem>>, vector<16x64xf32>
    %cst_8 = arith.constant 0.000000e+00 : f32
    %9 = vector.broadcast %cst_8 : f32 to vector<2x16xf32>
    %cst_9 = arith.constant 0.000000e+00 : f32
    %10 = vector.broadcast %cst_9 : f32 to vector<2x16xf32>
    %11 = vector.extract_strided_slice %7 {offsets = [0, 0, 0], sizes = [2, 1, 64], strides = [1, 1, 1]} : vector<2x8x64xf32> to vector<2x1x64xf32>
    %12 = vector.shape_cast %11 : vector<2x1x64xf32> to vector<2x64xf32>
    %cst_10 = arith.constant dense<0.000000e+00> : vector<2x64xf32>
    %13 = tpu.matmul %9, %8, %cst_10 {dimension_numbers = #tpu.dot_dimension_numbers<[1], [0], [0], [1], [0, 0, 1, 1], [], []>} : vector<2x16xf32>, vector<16x64xf32>, vector<2x64xf32> -> vector<2x64xf32>
    %14 = arith.addf %12, %13 : vector<2x64xf32>
    %15 = arith.negf %14 : vector<2x64xf32>
    %16 = math.exp %15 : vector<2x64xf32>
    %cst_11 = arith.constant 1.000000e+00 : f32
    %17 = vector.broadcast %cst_11 : f32 to vector<2x64xf32>
    %18 = arith.addf %17, %16 : vector<2x64xf32>
    %19 = arith.divf %17, %18 : vector<2x64xf32>
    %20 = math.tanh %14 : vector<2x64xf32>
    %21 = vector.extract_strided_slice %19 {offsets = [0, 0], sizes = [2, 16], strides = [1, 1]} : vector<2x64xf32> to vector<2x16xf32>
    %22 = vector.extract_strided_slice %19 {offsets = [0, 16], sizes = [2, 16], strides = [1, 1]} : vector<2x64xf32> to vector<2x16xf32>
    %23 = vector.extract_strided_slice %20 {offsets = [0, 32], sizes = [2, 16], strides = [1, 1]} : vector<2x64xf32> to vector<2x16xf32>
    %24 = vector.extract_strided_slice %19 {offsets = [0, 48], sizes = [2, 16], strides = [1, 1]} : vector<2x64xf32> to vector<2x16xf32>
    %25 = arith.mulf %22, %10 : vector<2x16xf32>
    %26 = arith.mulf %21, %23 : vector<2x16xf32>
    %27 = arith.addf %25, %26 : vector<2x16xf32>
    %28 = math.tanh %27 : vector<2x16xf32>
    %29 = arith.mulf %24, %28 : vector<2x16xf32>
    %c0_12 = arith.constant 0 : index
    %c0_13 = arith.constant 0 : index
    %c0_14 = arith.constant 0 : index
    %30 = vector.load %arg9[%c0_12, %c0_13, %c0_14] : memref<2x8x16xf32, #tpu.memory_space<vmem>>, vector<2x1x16xf32>
    %31 = vector.shape_cast %30 : vector<2x1x16xf32> to vector<2x16xf32>
    %32 = vector.shape_cast %29 : vector<2x16xf32> to vector<2x1x16xf32>
    tpu.vector_store %arg9[%c0_12, %c0_13, %c0_14], %32 {strides = array<i32>} : memref<2x8x16xf32, #tpu.memory_space<vmem>>, vector<2x1x16xf32>,
    %33 = vector.extract_strided_slice %7 {offsets = [0, 1, 0], sizes = [2, 1, 64], strides = [1, 1, 1]} : vector<2x8x64xf32> to vector<2x1x64xf32>
    %34 = vector.shape_cast %33 : vector<2x1x64xf32> to vector<2x64xf32>
    %cst_15 = arith.constant dense<0.000000e+00> : vector<2x64xf32>
    %35 = tpu.matmul %29, %8, %cst_15 {dimension_numbers = #tpu.dot_dimension_numbers<[1], [0], [0], [1], [0, 0, 1, 1], [], []>} : vector<2x16xf32>, vector<16x64xf32>, vector<2x64xf32> -> vector<2x64xf32>
    %36 = arith.addf %34, %35 : vector<2x64xf32>
    %37 = arith.negf %36 : vector<2x64xf32>
    %38 = math.exp %37 : vector<2x64xf32>
    %cst_16 = arith.constant 1.000000e+00 : f32
    %39 = vector.broadcast %cst_16 : f32 to vector<2x64xf32>
    %40 = arith.addf %39, %38 : vector<2x64xf32>
    %41 = arith.divf %39, %40 : vector<2x64xf32>
    %42 = math.tanh %36 : vector<2x64xf32>
    %43 = vector.extract_strided_slice %41 {offsets = [0, 0], sizes = [2, 16], strides = [1, 1]} : vector<2x64xf32> to vector<2x16xf32>
    %44 = vector.extract_strided_slice %41 {offsets = [0, 16], sizes = [2, 16], strides = [1, 1]} : vector<2x64xf32> to vector<2x16xf32>
    %45 = vector.extract_strided_slice %42 {offsets = [0, 32], sizes = [2, 16], strides = [1, 1]} : vector<2x64xf32> to vector<2x16xf32>
    %46 = vector.extract_strided_slice %41 {offsets = [0, 48], sizes = [2, 16], strides = [1, 1]} : vector<2x64xf32> to vector<2x16xf32>
    %47 = arith.mulf %44, %27 : vector<2x16xf32>
    %48 = arith.mulf %43, %45 : vector<2x16xf32>
    %49 = arith.addf %47, %48 : vector<2x16xf32>
    %50 = math.tanh %49 : vector<2x16xf32>
    %51 = arith.mulf %46, %50 : vector<2x16xf32>
    %c0_17 = arith.constant 0 : index
    %c1 = arith.constant 1 : index
    %c0_18 = arith.constant 0 : index
    %52 = vector.load %arg9[%c0_17, %c1, %c0_18] : memref<2x8x16xf32, #tpu.memory_space<vmem>>, vector<2x1x16xf32>
    %53 = vector.shape_cast %52 : vector<2x1x16xf32> to vector<2x16xf32>
    %54 = vector.shape_cast %51 : vector<2x16xf32> to vector<2x1x16xf32>
    tpu.vector_store %arg9[%c0_17, %c1, %c0_18], %54 {strides = array<i32>} : memref<2x8x16xf32, #tpu.memory_space<vmem>>, vector<2x1x16xf32>,
    %55 = vector.extract_strided_slice %7 {offsets = [0, 2, 0], sizes = [2, 1, 64], strides = [1, 1, 1]} : vector<2x8x64xf32> to vector<2x1x64xf32>
    %56 = vector.shape_cast %55 : vector<2x1x64xf32> to vector<2x64xf32>
    %cst_19 = arith.constant dense<0.000000e+00> : vector<2x64xf32>
    %57 = tpu.matmul %51, %8, %cst_19 {dimension_numbers = #tpu.dot_dimension_numbers<[1], [0], [0], [1], [0, 0, 1, 1], [], []>} : vector<2x16xf32>, vector<16x64xf32>, vector<2x64xf32> -> vector<2x64xf32>
    %58 = arith.addf %56, %57 : vector<2x64xf32>
    %59 = arith.negf %58 : vector<2x64xf32>
    %60 = math.exp %59 : vector<2x64xf32>
    %cst_20 = arith.constant 1.000000e+00 : f32
    %61 = vector.broadcast %cst_20 : f32 to vector<2x64xf32>
    %62 = arith.addf %61, %60 : vector<2x64xf32>
    %63 = arith.divf %61, %62 : vector<2x64xf32>
    %64 = math.tanh %58 : vector<2x64xf32>
    %65 = vector.extract_strided_slice %63 {offsets = [0, 0], sizes = [2, 16], strides = [1, 1]} : vector<2x64xf32> to vector<2x16xf32>
    %66 = vector.extract_strided_slice %63 {offsets = [0, 16], sizes = [2, 16], strides = [1, 1]} : vector<2x64xf32> to vector<2x16xf32>
    %67 = vector.extract_strided_slice %64 {offsets = [0, 32], sizes = [2, 16], strides = [1, 1]} : vector<2x64xf32> to vector<2x16xf32>
    %68 = vector.extract_strided_slice %63 {offsets = [0, 48], sizes = [2, 16], strides = [1, 1]} : vector<2x64xf32> to vector<2x16xf32>
    %69 = arith.mulf %66, %49 : vector<2x16xf32>
    %70 = arith.mulf %65, %67 : vector<2x16xf32>
    %71 = arith.addf %69, %70 : vector<2x16xf32>
    %72 = math.tanh %71 : vector<2x16xf32>
    %73 = arith.mulf %68, %72 : vector<2x16xf32>
    %c0_21 = arith.constant 0 : index
    %c2 = arith.constant 2 : index
    %c0_22 = arith.constant 0 : index
    %74 = vector.load %arg9[%c0_21, %c2, %c0_22] : memref<2x8x16xf32, #tpu.memory_space<vmem>>, vector<2x1x16xf32>
    %75 = vector.shape_cast %74 : vector<2x1x16xf32> to vector<2x16xf32>
    %76 = vector.shape_cast %73 : vector<2x16xf32> to vector<2x1x16xf32>
    tpu.vector_store %arg9[%c0_21, %c2, %c0_22], %76 {strides = array<i32>} : memref<2x8x16xf32, #tpu.memory_space<vmem>>, vector<2x1x16xf32>,
    %77 = vector.extract_strided_slice %7 {offsets = [0, 3, 0], sizes = [2, 1, 64], strides = [1, 1, 1]} : vector<2x8x64xf32> to vector<2x1x64xf32>
    %78 = vector.shape_cast %77 : vector<2x1x64xf32> to vector<2x64xf32>
    %cst_23 = arith.constant dense<0.000000e+00> : vector<2x64xf32>
    %79 = tpu.matmul %73, %8, %cst_23 {dimension_numbers = #tpu.dot_dimension_numbers<[1], [0], [0], [1], [0, 0, 1, 1], [], []>} : vector<2x16xf32>, vector<16x64xf32>, vector<2x64xf32> -> vector<2x64xf32>
    %80 = arith.addf %78, %79 : vector<2x64xf32>
    %81 = arith.negf %80 : vector<2x64xf32>
    %82 = math.exp %81 : vector<2x64xf32>
    %cst_24 = arith.constant 1.000000e+00 : f32
    %83 = vector.broadcast %cst_24 : f32 to vector<2x64xf32>
    %84 = arith.addf %83, %82 : vector<2x64xf32>
    %85 = arith.divf %83, %84 : vector<2x64xf32>
    %86 = math.tanh %80 : vector<2x64xf32>
    %87 = vector.extract_strided_slice %85 {offsets = [0, 0], sizes = [2, 16], strides = [1, 1]} : vector<2x64xf32> to vector<2x16xf32>
    %88 = vector.extract_strided_slice %85 {offsets = [0, 16], sizes = [2, 16], strides = [1, 1]} : vector<2x64xf32> to vector<2x16xf32>
    %89 = vector.extract_strided_slice %86 {offsets = [0, 32], sizes = [2, 16], strides = [1, 1]} : vector<2x64xf32> to vector<2x16xf32>
    %90 = vector.extract_strided_slice %85 {offsets = [0, 48], sizes = [2, 16], strides = [1, 1]} : vector<2x64xf32> to vector<2x16xf32>
    %91 = arith.mulf %88, %71 : vector<2x16xf32>
    %92 = arith.mulf %87, %89 : vector<2x16xf32>
    %93 = arith.addf %91, %92 : vector<2x16xf32>
    %94 = math.tanh %93 : vector<2x16xf32>
    %95 = arith.mulf %90, %94 : vector<2x16xf32>
    %c0_25 = arith.constant 0 : index
    %c3 = arith.constant 3 : index
    %c0_26 = arith.constant 0 : index
    %96 = vector.load %arg9[%c0_25, %c3, %c0_26] : memref<2x8x16xf32, #tpu.memory_space<vmem>>, vector<2x1x16xf32>
    %97 = vector.shape_cast %96 : vector<2x1x16xf32> to vector<2x16xf32>
    %98 = vector.shape_cast %95 : vector<2x16xf32> to vector<2x1x16xf32>
    tpu.vector_store %arg9[%c0_25, %c3, %c0_26], %98 {strides = array<i32>} : memref<2x8x16xf32, #tpu.memory_space<vmem>>, vector<2x1x16xf32>,
    %99 = vector.extract_strided_slice %7 {offsets = [0, 4, 0], sizes = [2, 1, 64], strides = [1, 1, 1]} : vector<2x8x64xf32> to vector<2x1x64xf32>
    %100 = vector.shape_cast %99 : vector<2x1x64xf32> to vector<2x64xf32>
    %cst_27 = arith.constant dense<0.000000e+00> : vector<2x64xf32>
    %101 = tpu.matmul %95, %8, %cst_27 {dimension_numbers = #tpu.dot_dimension_numbers<[1], [0], [0], [1], [0, 0, 1, 1], [], []>} : vector<2x16xf32>, vector<16x64xf32>, vector<2x64xf32> -> vector<2x64xf32>
    %102 = arith.addf %100, %101 : vector<2x64xf32>
    %103 = arith.negf %102 : vector<2x64xf32>
    %104 = math.exp %103 : vector<2x64xf32>
    %cst_28 = arith.constant 1.000000e+00 : f32
    %105 = vector.broadcast %cst_28 : f32 to vector<2x64xf32>
    %106 = arith.addf %105, %104 : vector<2x64xf32>
    %107 = arith.divf %105, %106 : vector<2x64xf32>
    %108 = math.tanh %102 : vector<2x64xf32>
    %109 = vector.extract_strided_slice %107 {offsets = [0, 0], sizes = [2, 16], strides = [1, 1]} : vector<2x64xf32> to vector<2x16xf32>
    %110 = vector.extract_strided_slice %107 {offsets = [0, 16], sizes = [2, 16], strides = [1, 1]} : vector<2x64xf32> to vector<2x16xf32>
    %111 = vector.extract_strided_slice %108 {offsets = [0, 32], sizes = [2, 16], strides = [1, 1]} : vector<2x64xf32> to vector<2x16xf32>
    %112 = vector.extract_strided_slice %107 {offsets = [0, 48], sizes = [2, 16], strides = [1, 1]} : vector<2x64xf32> to vector<2x16xf32>
    %113 = arith.mulf %110, %93 : vector<2x16xf32>
    %114 = arith.mulf %109, %111 : vector<2x16xf32>
    %115 = arith.addf %113, %114 : vector<2x16xf32>
    %116 = math.tanh %115 : vector<2x16xf32>
    %117 = arith.mulf %112, %116 : vector<2x16xf32>
    %c0_29 = arith.constant 0 : index
    %c4 = arith.constant 4 : index
    %c0_30 = arith.constant 0 : index
    %118 = vector.load %arg9[%c0_29, %c4, %c0_30] : memref<2x8x16xf32, #tpu.memory_space<vmem>>, vector<2x1x16xf32>
    %119 = vector.shape_cast %118 : vector<2x1x16xf32> to vector<2x16xf32>
    %120 = vector.shape_cast %117 : vector<2x16xf32> to vector<2x1x16xf32>
    tpu.vector_store %arg9[%c0_29, %c4, %c0_30], %120 {strides = array<i32>} : memref<2x8x16xf32, #tpu.memory_space<vmem>>, vector<2x1x16xf32>,
    %121 = vector.extract_strided_slice %7 {offsets = [0, 5, 0], sizes = [2, 1, 64], strides = [1, 1, 1]} : vector<2x8x64xf32> to vector<2x1x64xf32>
    %122 = vector.shape_cast %121 : vector<2x1x64xf32> to vector<2x64xf32>
    %cst_31 = arith.constant dense<0.000000e+00> : vector<2x64xf32>
    %123 = tpu.matmul %117, %8, %cst_31 {dimension_numbers = #tpu.dot_dimension_numbers<[1], [0], [0], [1], [0, 0, 1, 1], [], []>} : vector<2x16xf32>, vector<16x64xf32>, vector<2x64xf32> -> vector<2x64xf32>
    %124 = arith.addf %122, %123 : vector<2x64xf32>
    %125 = arith.negf %124 : vector<2x64xf32>
    %126 = math.exp %125 : vector<2x64xf32>
    %cst_32 = arith.constant 1.000000e+00 : f32
    %127 = vector.broadcast %cst_32 : f32 to vector<2x64xf32>
    %128 = arith.addf %127, %126 : vector<2x64xf32>
    %129 = arith.divf %127, %128 : vector<2x64xf32>
    %130 = math.tanh %124 : vector<2x64xf32>
    %131 = vector.extract_strided_slice %129 {offsets = [0, 0], sizes = [2, 16], strides = [1, 1]} : vector<2x64xf32> to vector<2x16xf32>
    %132 = vector.extract_strided_slice %129 {offsets = [0, 16], sizes = [2, 16], strides = [1, 1]} : vector<2x64xf32> to vector<2x16xf32>
    %133 = vector.extract_strided_slice %130 {offsets = [0, 32], sizes = [2, 16], strides = [1, 1]} : vector<2x64xf32> to vector<2x16xf32>
    %134 = vector.extract_strided_slice %129 {offsets = [0, 48], sizes = [2, 16], strides = [1, 1]} : vector<2x64xf32> to vector<2x16xf32>
    %135 = arith.mulf %132, %115 : vector<2x16xf32>
    %136 = arith.mulf %131, %133 : vector<2x16xf32>
    %137 = arith.addf %135, %136 : vector<2x16xf32>
    %138 = math.tanh %137 : vector<2x16xf32>
    %139 = arith.mulf %134, %138 : vector<2x16xf32>
    %c0_33 = arith.constant 0 : index
    %c5 = arith.constant 5 : index
    %c0_34 = arith.constant 0 : index
    %140 = vector.load %arg9[%c0_33, %c5, %c0_34] : memref<2x8x16xf32, #tpu.memory_space<vmem>>, vector<2x1x16xf32>
    %141 = vector.shape_cast %140 : vector<2x1x16xf32> to vector<2x16xf32>
    %142 = vector.shape_cast %139 : vector<2x16xf32> to vector<2x1x16xf32>
    tpu.vector_store %arg9[%c0_33, %c5, %c0_34], %142 {strides = array<i32>} : memref<2x8x16xf32, #tpu.memory_space<vmem>>, vector<2x1x16xf32>,
    %143 = vector.extract_strided_slice %7 {offsets = [0, 6, 0], sizes = [2, 1, 64], strides = [1, 1, 1]} : vector<2x8x64xf32> to vector<2x1x64xf32>
    %144 = vector.shape_cast %143 : vector<2x1x64xf32> to vector<2x64xf32>
    %cst_35 = arith.constant dense<0.000000e+00> : vector<2x64xf32>
    %145 = tpu.matmul %139, %8, %cst_35 {dimension_numbers = #tpu.dot_dimension_numbers<[1], [0], [0], [1], [0, 0, 1, 1], [], []>} : vector<2x16xf32>, vector<16x64xf32>, vector<2x64xf32> -> vector<2x64xf32>
    %146 = arith.addf %144, %145 : vector<2x64xf32>
    %147 = arith.negf %146 : vector<2x64xf32>
    %148 = math.exp %147 : vector<2x64xf32>
    %cst_36 = arith.constant 1.000000e+00 : f32
    %149 = vector.broadcast %cst_36 : f32 to vector<2x64xf32>
    %150 = arith.addf %149, %148 : vector<2x64xf32>
    %151 = arith.divf %149, %150 : vector<2x64xf32>
    %152 = math.tanh %146 : vector<2x64xf32>
    %153 = vector.extract_strided_slice %151 {offsets = [0, 0], sizes = [2, 16], strides = [1, 1]} : vector<2x64xf32> to vector<2x16xf32>
    %154 = vector.extract_strided_slice %151 {offsets = [0, 16], sizes = [2, 16], strides = [1, 1]} : vector<2x64xf32> to vector<2x16xf32>
    %155 = vector.extract_strided_slice %152 {offsets = [0, 32], sizes = [2, 16], strides = [1, 1]} : vector<2x64xf32> to vector<2x16xf32>
    %156 = vector.extract_strided_slice %151 {offsets = [0, 48], sizes = [2, 16], strides = [1, 1]} : vector<2x64xf32> to vector<2x16xf32>
    %157 = arith.mulf %154, %137 : vector<2x16xf32>
    %158 = arith.mulf %153, %155 : vector<2x16xf32>
    %159 = arith.addf %157, %158 : vector<2x16xf32>
    %160 = math.tanh %159 : vector<2x16xf32>
    %161 = arith.mulf %156, %160 : vector<2x16xf32>
    %c0_37 = arith.constant 0 : index
    %c6 = arith.constant 6 : index
    %c0_38 = arith.constant 0 : index
    %162 = vector.load %arg9[%c0_37, %c6, %c0_38] : memref<2x8x16xf32, #tpu.memory_space<vmem>>, vector<2x1x16xf32>
    %163 = vector.shape_cast %162 : vector<2x1x16xf32> to vector<2x16xf32>
    %164 = vector.shape_cast %161 : vector<2x16xf32> to vector<2x1x16xf32>
    tpu.vector_store %arg9[%c0_37, %c6, %c0_38], %164 {strides = array<i32>} : memref<2x8x16xf32, #tpu.memory_space<vmem>>, vector<2x1x16xf32>,
    %165 = vector.extract_strided_slice %7 {offsets = [0, 7, 0], sizes = [2, 1, 64], strides = [1, 1, 1]} : vector<2x8x64xf32> to vector<2x1x64xf32>
    %166 = vector.shape_cast %165 : vector<2x1x64xf32> to vector<2x64xf32>
    %cst_39 = arith.constant dense<0.000000e+00> : vector<2x64xf32>
    %167 = tpu.matmul %161, %8, %cst_39 {dimension_numbers = #tpu.dot_dimension_numbers<[1], [0], [0], [1], [0, 0, 1, 1], [], []>} : vector<2x16xf32>, vector<16x64xf32>, vector<2x64xf32> -> vector<2x64xf32>
    %168 = arith.addf %166, %167 : vector<2x64xf32>
    %169 = arith.negf %168 : vector<2x64xf32>
    %170 = math.exp %169 : vector<2x64xf32>
    %cst_40 = arith.constant 1.000000e+00 : f32
    %171 = vector.broadcast %cst_40 : f32 to vector<2x64xf32>
    %172 = arith.addf %171, %170 : vector<2x64xf32>
    %173 = arith.divf %171, %172 : vector<2x64xf32>
    %174 = math.tanh %168 : vector<2x64xf32>
    %175 = vector.extract_strided_slice %173 {offsets = [0, 0], sizes = [2, 16], strides = [1, 1]} : vector<2x64xf32> to vector<2x16xf32>
    %176 = vector.extract_strided_slice %173 {offsets = [0, 16], sizes = [2, 16], strides = [1, 1]} : vector<2x64xf32> to vector<2x16xf32>
    %177 = vector.extract_strided_slice %174 {offsets = [0, 32], sizes = [2, 16], strides = [1, 1]} : vector<2x64xf32> to vector<2x16xf32>
    %178 = vector.extract_strided_slice %173 {offsets = [0, 48], sizes = [2, 16], strides = [1, 1]} : vector<2x64xf32> to vector<2x16xf32>
    %179 = arith.mulf %176, %159 : vector<2x16xf32>
    %180 = arith.mulf %175, %177 : vector<2x16xf32>
    %181 = arith.addf %179, %180 : vector<2x16xf32>
    %182 = math.tanh %181 : vector<2x16xf32>
    %183 = arith.mulf %178, %182 : vector<2x16xf32>
    %c0_41 = arith.constant 0 : index
    %c7 = arith.constant 7 : index
    %c0_42 = arith.constant 0 : index
    %184 = vector.load %arg9[%c0_41, %c7, %c0_42] : memref<2x8x16xf32, #tpu.memory_space<vmem>>, vector<2x1x16xf32>
    %185 = vector.shape_cast %184 : vector<2x1x16xf32> to vector<2x16xf32>
    %186 = vector.shape_cast %183 : vector<2x16xf32> to vector<2x1x16xf32>
    tpu.vector_store %arg9[%c0_41, %c7, %c0_42], %186 {strides = array<i32>} : memref<2x8x16xf32, #tpu.memory_space<vmem>>, vector<2x1x16xf32>,
    %c0_43 = arith.constant 0 : index
    %c0_44 = arith.constant 0 : index
    %c0_45 = arith.constant 0 : index
    %187 = vector.load %arg9[%c0_43, %c0_44, %c0_45] : memref<2x8x16xf32, #tpu.memory_space<vmem>>, vector<2x8x16xf32>
    %188 = vector.shape_cast %187 : vector<2x8x16xf32> to vector<16x16xf32>
    %c0_46 = arith.constant 0 : index
    %c0_47 = arith.constant 0 : index
    %189 = vector.load %arg4[%c0_46, %c0_47] : memref<16x10xf32, #tpu.memory_space<vmem>>, vector<16x10xf32>
    %cst_48 = arith.constant dense<0.000000e+00> : vector<16x10xf32>
    %190 = tpu.matmul %188, %189, %cst_48 {dimension_numbers = #tpu.dot_dimension_numbers<[1], [0], [0], [1], [0, 0, 1, 1], [], []>} : vector<16x16xf32>, vector<16x10xf32>, vector<16x10xf32> -> vector<16x10xf32>
    %c0_49 = arith.constant 0 : index
    %c0_50 = arith.constant 0 : index
    %191 = vector.load %arg5[%c0_49, %c0_50] : memref<1x10xf32, #tpu.memory_space<vmem>>, vector<1x10xf32>
    %192 = vector.broadcast %191 : vector<1x10xf32> to vector<16x10xf32>
    %193 = arith.addf %190, %192 : vector<16x10xf32>
    %cst_51 = arith.constant 0.000000e+00 : f32
    %194 = vector.broadcast %cst_51 : f32 to vector<16x10xf32>
    %195 = arith.maximumf %193, %194 : vector<16x10xf32>
    %c0_52 = arith.constant 0 : index
    %c0_53 = arith.constant 0 : index
    %196 = vector.load %arg6[%c0_52, %c0_53] : memref<10x2xf32, #tpu.memory_space<vmem>>, vector<10x2xf32>
    %cst_54 = arith.constant dense<0.000000e+00> : vector<16x2xf32>
    %197 = tpu.matmul %195, %196, %cst_54 {dimension_numbers = #tpu.dot_dimension_numbers<[1], [0], [0], [1], [0, 0, 1, 1], [], []>} : vector<16x10xf32>, vector<10x2xf32>, vector<16x2xf32> -> vector<16x2xf32>
    %c0_55 = arith.constant 0 : index
    %c0_56 = arith.constant 0 : index
    %198 = vector.load %arg7[%c0_55, %c0_56] : memref<1x2xf32, #tpu.memory_space<vmem>>, vector<1x2xf32>
    %199 = vector.broadcast %198 : vector<1x2xf32> to vector<16x2xf32>
    %200 = arith.addf %197, %199 : vector<16x2xf32>
    %201 = vector.shape_cast %200 : vector<16x2xf32> to vector<2x8x2xf32>
    %c0_57 = arith.constant 0 : index
    %c0_58 = arith.constant 0 : index
    %c0_59 = arith.constant 0 : index
    %202 = vector.load %arg8[%c0_57, %c0_58, %c0_59] : memref<2x8x2xf32, #tpu.memory_space<vmem>>, vector<2x8x2xf32>
    tpu.vector_store %arg8[%c0_57, %c0_58, %c0_59], %201 {strides = array<i32>} : memref<2x8x2xf32, #tpu.memory_space<vmem>>, vector<2x8x2xf32>,
    return
  }
}

</mosaic_0001>

<bundles_post_ra>
// kernel: tpu_custom_call.1
= control target key start
LH: loop header
LB: loop body
LE: loop exit
PB: predicated region body
PF: predicated region fallthrough
CT: control target
= control target key end

     0   :  { %13 = vsyncpa [#allocation4], 0  ;;  %s2221_s0 = inlined_call_operand.vmem [shape: f32[2,8,8], index: 0, kind: input, shape index: {}]   ;;  %s2222_s1 = inlined_call_operand.hbm [shape: f32[8,64], index: 1, kind: input, shape index: {}]   ;;  %s2223_s2 = inlined_call_operand.hbm [shape: f32[16,64], index: 2, kind: input, shape index: {}]   ;;  %s2224_s3 = inlined_call_operand.vmem [shape: f32[1,64], index: 3, kind: input, shape index: {}]   ;;  %s2225_s4 = inlined_call_operand.vmem [shape: f32[16,10], index: 4, kind: input, shape index: {}]   ;;  %s2226_s5 = inlined_call_operand.vmem [shape: f32[1,10], index: 5, kind: input, shape index: {}]   ;;  %s2227_s6 = inlined_call_operand.vmem [shape: f32[10,2], index: 6, kind: input, shape index: {}]   ;;  %s2228_s7 = inlined_call_operand.vmem [shape: f32[1,2], index: 7, kind: input, shape index: {}]   ;;  %s2229_s8 = inlined_call_operand.vmem [shape: f32[2,8,2], index: 8, kind: output, shape index: {}]  }
   0x1   :  { %14 = vsyncpa [#allocation6], 0  ;;  %s1892_s27 = smov [#allocation3]   ;;  %s1893_s29 = smov [#allocation5]  }
   0x2   :  { %s23_s28 = sshll.u32 %s1892_s27, 4  ;;  %s32_s30 = sshll.u32 %s1893_s29, 4  ;;  %s24_s28 = int_to_ptr.vmem [resolvable:$true] %s23_s28  ;;  %s1949_s30 = int_to_ptr.vmem [resolvable:$true] %s32_s30 }
   0x3   :  { %s1844_s11 = scalar_lea.hbm %s2222_s1, 128 }
   0x4   :  { %p1845_p0 = scmp.ne.s32.totalorder %s2222_s1, %s1844_s11  ;;  %p1848_p1 = scmp.lt.u32.totalorder %s1844_s11, %s2222_s1 }
   0x6   :  { %p1850_p2 = pnand %p1848_p1, %p1845_p0 }
   0x8   :  { %1853 = shalt.err (!%p1850_p2)
}
   0x9   :  { %s1854_s16 = scalar_lea.vmem %s24_s28, 128  ;;  %p1859_p4 = scmp.lt.s32.totalorder %s24_s28, %s24_s28 }
   0xa   :  { %p1855_p3 = scmp.ne.s32.totalorder %s24_s28, %s1854_s16  ;;  %p1860_p5 = scmp.lt.s32.totalorder %s1854_s16, %s1854_s16 }
   0xc   :  { %p1861_p6 = por %p1860_p5, %p1859_p4 }
   0xe   :  { %p1862_p7 = pnand %p1861_p6, %p1855_p3 }
  0x10   :  { %1865 = shalt.err (!%p1862_p7)
}
  0x11   :  { %26 = dma.hbm_to_vmem [thread:$0]  %s2222_s1, 128, %s24_s28, [#allocation4]  }
  0x12   :  { %s1866_s21 = scalar_lea.hbm %s2223_s2, 256 }
  0x13   :  { %p1867_p8 = scmp.ne.s32.totalorder %s2223_s2, %s1866_s21  ;;  %p1870_p9 = scmp.lt.u32.totalorder %s1866_s21, %s2223_s2 }
  0x15   :  { %p1872_p10 = pnand %p1870_p9, %p1867_p8 }
  0x17   :  { %1875 = shalt.err (!%p1872_p10)
}
  0x18   :  { %s1876_s26 = scalar_lea.vmem %s1949_s30, 256  ;;  %p1881_p12 = scmp.lt.s32.totalorder %s1949_s30, %s1949_s30 }
  0x19   :  { %p1877_p11 = scmp.ne.s32.totalorder %s1949_s30, %s1876_s26  ;;  %p1882_p13 = scmp.lt.s32.totalorder %s1876_s26, %s1876_s26 }
  0x1b   :  { %p1883_p0 = por %p1882_p13, %p1881_p12 }
  0x1d   :  { %p1884_p1 = pnand %p1883_p0, %p1877_p11 }
  0x1f   :  { %1887 = shalt.err (!%p1884_p1)
}
  0x20   :  { %s1894_s1 = smov 128   ;;  %s1895_s27 = smov 8  }
  0x21   :  { %38 = dma.hbm_to_vmem [thread:$0]  %s2223_s2, 256, %s1949_s30, [#allocation6], %s1894_s1, %s1894_s1, %s1895_s27  }
  0x22   :  { %1888 = dma.done.wait [#allocation4], 128  }
  0x23   :  { %1889 = vsyncadd [#allocation4], 4294967168 }
  0x24   :  { %1890 = dma.done.wait [#allocation6], 256  }
  0x25   :  { %1891 = vsyncadd [#allocation6], 4294967040  ;;  %v1896_v0 = vmov 0.0|0.0   ;;  %vm1897_vm0 = vmmov 0   ;;  %v1898_v1 = vmov 0.0   ;;  %vm65_vm1 = vcmask 64512  }
  0x26   :  { %1670 = vmatprep.subr.bf16.mxu1 %v1896_v0  ;;  %1604 = vmatprep.mubr.msk.f32.mxu1 %vm1897_vm0, %v1898_v1  ;;  %v57_v2 = vld [vmem:[#allocation3] sm:$0xff]  ;;  %v55_v3 = vld [vmem:[%s2221_s0] sm:$0xff]  ;;  %v56_v4 = vld [vmem:[%s2221_s0 + $0x8] sm:$0xff]  ;;  %s1899_s12 = smov 96   ;;  %s1901_s13 = smov 32   ;;  %vm289_vm2 = vcmask 1041409  }
  0x27   :  { %1595 = vmatprep.subr.mxu0 %v57_v2  ;;  %1597 = vmatprep.mubr.msk.f32.mxu0 %vm65_vm1, %v55_v3  ;;  %v147_v5 = vld [vmem:[#allocation5] sm:$0xff]  ;;  %v148_v6 = vld [vmem:[#allocation5 + $0x8] sm:$0xff]  ;;  %s1902_s14 = smov 80   ;;  %vm149_vm3 = vcmask 130048   ;;  %vm285_vm4 = vcmask 122880   ;;  %vm433_vm5 = vcmask 123905  }
  0x28   :  { %1596 = vmatpush3.msra.mxu0 %v57_v2  ;;  %v1989_v7 = vpack.c.bf16 %v148_v6, %v147_v5  ;;  %v1527_v10 = vld [vmem:[%s2224_s3] ss:$0 sm:$0xff]  ;;  %s1900_s3 = smov 16   ;;  %vm581_vm6 = vcmask 124930   ;;  %vm730_vm7 = vcmask 125955   ;;  %vm879_vm8 = vcmask 126980  }
  0x29   :  { %1598 = vmatmul.mubr.msk.f32.vlgmr.msra.gmra.mrb[0].mxu0 %vm65_vm1, %v56_v4  ;;  %1673 = vmatprep.subr.bf16.mxu0 %v1896_v0  ;;  %vm1028_vm9 = vcmask 128005   ;;  %vm1177_vm10 = vcmask 129030   ;;  %vm1326_vm11 = vcmask 130055   ;;  %vm1439_vm12 = vcmask 1041408  }
  0x2a   :  { %1672 = vmatpush3.bf16.msra.mxu1 %v1989_v7  ;;  %1675 = vmatpush3.bf16.msra.mxu0 %v1989_v7  ;;  %vm1903_vm13 = vmmov 1   ;;  %vm1432_vm15 = vcmask 80896  }
  0x2b   :  { %1611 = vmatprep.mubr.msk.f32.mxu0 %vm1897_vm0, %v1898_v1  ;;  %1676 = vmatprep.subr.bf16.mxu1 %v1896_v0  ;;  %vm1699_vm14 = vmpackc.low %vm1439_vm12, %vm1903_vm13 }
  0x2c   :  { %1679 = vmatprep.subr.bf16.mxu0 %v1896_v0 }
  0x2d   :  { %1605 = vmatmul.mubr.f32.vlgmr.msra.gmra.mrb[0].mxu1 %v1898_v1 }
  0x2e   :  { %1678 = vmatpush3.bf16.msra.mxu1 %v1989_v7  ;;  %1618 = vmatprep.mubr.msk.f32.mxu1 %vm1897_vm0, %v1898_v1 }
  0x2f   :  { %1682 = vmatprep.subr.bf16.mxu1 %v1896_v0 }
  0xfc   :  { %v1599_v8 = vpop.f32.mrb[0].mxu0 }
  0xfd   :  { %v138_v9 = vpop.f32.mrb[1].mxu0  ;;  %v2006_v11 = vadd.f32 %v1599_v8, %v1527_v10 }
  0xfe   :  { %v2008_v15 = vadd.f32 %v1527_v10, %v138_v9 }
 0x100   :  { %v219_v12 = vpop.f32.mrb[0].mxu1 }
 0x101   :  { %v224_v13 = vrot.slane %v219_v12, 1  ;;  %v1606_v14 = vpop.f32.mrb[1].mxu1  ;;  %v227_v17 = vadd.f32 %v219_v12, %v2008_v15 }
 0x103   :  { %v228_v16 = vadd.f32 %v224_v13, %v2006_v11  ;;  %v1530_v21 = vmul.f32 -1.442695, %v227_v17 }
 0x105   :  { %1716 = vtanh.f32 %v228_v16  ;;  %v1531_v20 = vmul.f32 -1.442695, %v228_v16 }
 0x106   :  { %1718 = vtanh.f32 %v227_v17 }
 0x107   :  { %1720 = vpow2.f32 %v1531_v20 }
 0x108   :  { %1722 = vpow2.f32 %v1530_v21 }
 0x10f   :  { %v1717_v18 = vpop.eup %1716 }
 0x110   :  { %249 = vrot.lane.b32.xlu0 %v1717_v18, %s1899_s12  ;;  %v1719_v19 = vpop.eup %1718 }
 0x111   :  { %v1721_v22 = vpop.eup %1720 }
 0x112   :  { %v236_v23 = vadd.f32 1.0, %v1721_v22  ;;  %v1723_v24 = vpop.eup %1722 }
 0x113   :  { %v235_v25 = vadd.f32 1.0, %v1723_v24 }
 0x114   :  { %247 = vrot.lane.b32.xlu0 %v1719_v19, %s1899_s12  ;;  %1724 = vrcp.f32 %v236_v23 }
 0x115   :  { %1726 = vrcp.f32 %v235_v25 }
 0x11e   :  { %v1725_v26 = vpop.eup %1724 }
 0x11f   :  { %v1727_v29 = vpop.eup %1726  ;;  %v244_v32 = vmul.f32 0.0, %v1725_v26 }
 0x120   :  { %v243_v35 = vmul.f32 0.0, %v1727_v29 }
 0x182   :  { %v250_v27 = vpop.permute.xlu0 %249 }
 0x183   :  { %v254_v28 = vmul.f32 %v1725_v26, %v250_v27 }
 0x185   :  { %259 = vrot.lane.b32.xlu1 %v254_v28, %s1900_s3 }
 0x186   :  { %v248_v30 = vpop.permute.xlu0 %247 }
 0x187   :  { %v253_v31 = vmul.f32 %v1727_v29, %v248_v30 }
 0x189   :  { %257 = vrot.lane.b32.xlu1 %v253_v31, %s1900_s3 }
 0x1f7   :  { %v260_v33 = vpop.permute.xlu1 %259 }
 0x1f8   :  { %v264_v34 = vadd.f32 %v260_v33, %v244_v32 }
 0x1fa   :  { %1728 = vtanh.f32 %v264_v34  ;;  %v388_v4 = vrot.slane %v264_v34, 7 }
 0x1fb   :  { %v258_v36 = vpop.permute.xlu1 %257 }
 0x1fc   :  { %v263_v37 = vadd.f32 %v258_v36, %v243_v35 }
 0x1fe   :  { %1730 = vtanh.f32 %v263_v37  ;;  %v387_v6 = vrot.slane %v263_v37, 7 }
 0x204   :  { %v1729_v38 = vpop.eup %1728 }
 0x205   :  { %271 = vrot.lane.b32.xlu0 %v1729_v38, %s1901_s13 }
 0x208   :  { %v1731_v39 = vpop.eup %1730 }
 0x209   :  { %269 = vrot.lane.b32.xlu1 %v1731_v39, %s1901_s13 }
 0x277   :  { %v272_v40 = vpop.permute.xlu0 %271 }
 0x278   :  { %v2018_v41 = vmul.f32 %v1725_v26, %v272_v40 }
 0x27a   :  { %v288_v43 = vrot.slane %v2018_v41, 7 }
 0x27b   :  { %v270_v42 = vpop.permute.xlu1 %269 }
 0x27c   :  { %v2021_v44 = vmul.f32 %v1727_v29, %v270_v42 }
 0x27e   :  { %v290_v45 = vsel %vm289_vm2, %v288_v43, %v2021_v44 }
 0x27f   :  { %291 = vrot.lane.b32.xlu0 %v290_v45, %s1902_s14 }
 0x2f1   :  { %v292_v46 = vpop.permute.xlu0 %291 }
 0x2f2   :  { %1612 = vmatmul.mubr.msk.f32.vlgmr.msra.gmra.mrb[2].mxu0 %vm149_vm3, %v292_v46 }
 0x2f3   :  { %1681 = vmatpush3.bf16.msra.mxu0 %v1989_v7  ;;  %1625 = vmatprep.mubr.msk.f32.mxu0 %vm1897_vm0, %v1898_v1 }
 0x2f4   :  { %1685 = vmatprep.subr.bf16.mxu0 %v1896_v0 }
 0x3c5   :  { %v361_v47 = vpop.f32.mrb[2].mxu0 }
 0x3c6   :  { %v366_v48 = vrot.slane %v361_v47, 7  ;;  %v370_v49 = vadd.f32 %v361_v47, %v2006_v11  ;;  %v1613_v50 = vpop.f32.mrb[3].mxu0 }
 0x3c8   :  { %v369_v51 = vadd.f32 %v366_v48, %v2008_v15  ;;  %1732 = vtanh.f32 %v370_v49  ;;  %v1534_v54 = vmul.f32 -1.442695, %v370_v49 }
 0x3ca   :  { %1734 = vtanh.f32 %v369_v51  ;;  %v1533_v55 = vmul.f32 -1.442695, %v369_v51 }
 0x3cb   :  { %1736 = vpow2.f32 %v1534_v54 }
 0x3cc   :  { %1738 = vpow2.f32 %v1533_v55 }
 0x3d2   :  { %v1733_v52 = vpop.eup %1732 }
 0x3d3   :  { %397 = vrot.lane.b32.xlu0 %v1733_v52, %s1899_s12 }
 0x3d4   :  { %v1735_v53 = vpop.eup %1734 }
 0x3d5   :  { %395 = vrot.lane.b32.xlu1 %v1735_v53, %s1899_s12  ;;  %v1737_v56 = vpop.eup %1736 }
 0x3d6   :  { %v1739_v57 = vpop.eup %1738  ;;  %v378_v58 = vadd.f32 1.0, %v1737_v56 }
 0x3d7   :  { %v377_v59 = vadd.f32 1.0, %v1739_v57 }
 0x3d8   :  { %1740 = vrcp.f32 %v378_v58 }
 0x3d9   :  { %1742 = vrcp.f32 %v377_v59 }
 0x3e2   :  { %v1741_v60 = vpop.eup %1740 }
 0x3e3   :  { %v1743_v63 = vpop.eup %1742  ;;  %v392_v5 = vmul.f32 %v1741_v60, %v388_v4 }
 0x3e4   :  { %v391_v10 = vmul.f32 %v1743_v63, %v387_v6 }
 0x445   :  { %v398_v61 = vpop.permute.xlu0 %397 }
 0x446   :  { %v402_v62 = vmul.f32 %v1741_v60, %v398_v61 }
 0x447   :  { %v396_v2 = vpop.permute.xlu1 %395 }
 0x448   :  { %407 = vrot.lane.b32.xlu0 %v402_v62, %s1900_s3  ;;  %v401_v3 = vmul.f32 %v1743_v63, %v396_v2 }
 0x44a   :  { %405 = vrot.lane.b32.xlu1 %v401_v3, %s1900_s3 }
 0x4ba   :  { %v408_v8 = vpop.permute.xlu0 %407 }
 0x4bb   :  { %v412_v9 = vadd.f32 %v408_v8, %v392_v5 }
 0x4bc   :  { %v406_v12 = vpop.permute.xlu1 %405 }
 0x4bd   :  { %1744 = vtanh.f32 %v412_v9  ;;  %v411_v13 = vadd.f32 %v406_v12, %v391_v10  ;;  %v536_v47 = vrot.slane %v412_v9, 7 }
 0x4bf   :  { %1746 = vtanh.f32 %v411_v13  ;;  %v535_v46 = vrot.slane %v411_v13, 7 }
 0x4c7   :  { %v1745_v14 = vpop.eup %1744 }
 0x4c8   :  { %419 = vrot.lane.b32.xlu0 %v1745_v14, %s1901_s13 }
 0x4c9   :  { %v1747_v16 = vpop.eup %1746 }
 0x4ca   :  { %417 = vrot.lane.b32.xlu1 %v1747_v16, %s1901_s13 }
 0x53a   :  { %v420_v17 = vpop.permute.xlu0 %419 }
 0x53b   :  { %v2041_v20 = vmul.f32 %v1741_v60, %v420_v17 }
 0x53c   :  { %v418_v18 = vpop.permute.xlu1 %417 }
 0x53d   :  { %v2039_v19 = vmul.f32 %v1743_v63, %v418_v18 }
 0x53f   :  { %v436_v21 = vrot.slane %v2039_v19, 1 }
 0x541   :  { %v437_v22 = vsel %vm289_vm2, %v2041_v20, %v436_v21 }
 0x542   :  { %438 = vrot.lane.b32.xlu1 %v437_v22, %s1902_s14 }
 0x5b4   :  { %v439_v23 = vpop.permute.xlu1 %438 }
 0x5b5   :  { %1619 = vmatmul.mubr.msk.f32.vlgmr.msra.gmra.mrb[2].mxu1 %vm149_vm3, %v439_v23 }
 0x5b6   :  { %1684 = vmatpush3.bf16.msra.mxu1 %v1989_v7  ;;  %1632 = vmatprep.mubr.msk.f32.mxu1 %vm1897_vm0, %v1898_v1 }
 0x5b7   :  { %1688 = vmatprep.subr.bf16.mxu1 %v1896_v0 }
 0x688   :  { %v508_v24 = vpop.f32.mrb[2].mxu1 }
 0x689   :  { %v513_v25 = vrot.slane %v508_v24, 6  ;;  %v514_v26 = vrot.slane %v508_v24, 7  ;;  %v1620_v27 = vpop.f32.mrb[3].mxu1 }
 0x68b   :  { %v517_v28 = vadd.f32 %v513_v25, %v2008_v15  ;;  %v518_v29 = vadd.f32 %v514_v26, %v2006_v11 }
 0x68d   :  { %1748 = vtanh.f32 %v517_v28  ;;  %v1536_v32 = vmul.f32 -1.442695, %v517_v28  ;;  %v1537_v33 = vmul.f32 -1.442695, %v518_v29 }
 0x68e   :  { %1750 = vtanh.f32 %v518_v29 }
 0x68f   :  { %1752 = vpow2.f32 %v1536_v32 }
 0x690   :  { %1754 = vpow2.f32 %v1537_v33 }
 0x697   :  { %v1749_v30 = vpop.eup %1748 }
 0x698   :  { %v1751_v31 = vpop.eup %1750  ;;  %543 = vrot.lane.b32.xlu0 %v1749_v30, %s1899_s12 }
 0x699   :  { %545 = vrot.lane.b32.xlu1 %v1751_v31, %s1899_s12  ;;  %v1753_v34 = vpop.eup %1752 }
 0x69a   :  { %v1755_v35 = vpop.eup %1754  ;;  %v525_v36 = vadd.f32 1.0, %v1753_v34 }
 0x69b   :  { %v526_v37 = vadd.f32 1.0, %v1755_v35 }
 0x69c   :  { %1756 = vrcp.f32 %v525_v36 }
 0x69d   :  { %1758 = vrcp.f32 %v526_v37 }
 0x6a6   :  { %v1757_v38 = vpop.eup %1756 }
 0x6a7   :  { %v1759_v40 = vpop.eup %1758  ;;  %v539_v48 = vmul.f32 %v1757_v38, %v535_v46 }
 0x6a8   :  { %v540_v49 = vmul.f32 %v1759_v40, %v536_v47 }
 0x70a   :  { %v544_v39 = vpop.permute.xlu0 %543 }
 0x70b   :  { %v546_v42 = vpop.permute.xlu1 %545  ;;  %v549_v43 = vmul.f32 %v1757_v38, %v544_v39 }
 0x70c   :  { %v550_v45 = vmul.f32 %v1759_v40, %v546_v42 }
 0x70d   :  { %553 = vrot.lane.b32.xlu0 %v549_v43, %s1900_s3 }
 0x70e   :  { %555 = vrot.lane.b32.xlu1 %v550_v45, %s1900_s3 }
 0x77f   :  { %v554_v50 = vpop.permute.xlu0 %553 }
 0x780   :  { %v556_v51 = vpop.permute.xlu1 %555  ;;  %v559_v52 = vadd.f32 %v554_v50, %v539_v48 }
 0x781   :  { %v560_v53 = vadd.f32 %v556_v51, %v540_v49 }
 0x782   :  { %1760 = vtanh.f32 %v559_v52  ;;  %v684_v26 = vrot.slane %v559_v52, 7 }
 0x783   :  { %1762 = vtanh.f32 %v560_v53  ;;  %v685_v27 = vrot.slane %v560_v53, 7 }
 0x78c   :  { %v1761_v54 = vpop.eup %1760 }
 0x78d   :  { %v1763_v55 = vpop.eup %1762  ;;  %565 = vrot.lane.b32.xlu0 %v1761_v54, %s1901_s13 }
 0x78e   :  { %567 = vrot.lane.b32.xlu1 %v1763_v55, %s1901_s13 }
 0x7ff   :  { %v566_v56 = vpop.permute.xlu0 %565 }
 0x800   :  { %v568_v57 = vpop.permute.xlu1 %567  ;;  %v2060_v58 = vmul.f32 %v1757_v38, %v566_v56 }
 0x801   :  { %v2062_v59 = vmul.f32 %v1759_v40, %v568_v57 }
 0x802   :  { %v584_v60 = vrot.slane %v2060_v58, 2 }
 0x803   :  { %v585_v61 = vrot.slane %v2062_v59, 1 }
 0x805   :  { %v586_v62 = vsel %vm289_vm2, %v585_v61, %v584_v60 }
 0x806   :  { %587 = vrot.lane.b32.xlu0 %v586_v62, %s1902_s14 }
 0x878   :  { %v588_v63 = vpop.permute.xlu0 %587 }
 0x879   :  { %1626 = vmatmul.mubr.msk.f32.vlgmr.msra.gmra.mrb[4].mxu0 %vm149_vm3, %v588_v63 }
 0x87a   :  { %1687 = vmatpush3.bf16.msra.mxu0 %v1989_v7  ;;  %1639 = vmatprep.mubr.msk.f32.mxu0 %vm1897_vm0, %v1898_v1 }
 0x87b   :  { %1691 = vmatprep.subr.bf16.mxu0 %v1896_v0 }
 0x94c   :  { %v657_v2 = vpop.f32.mrb[4].mxu0 }
 0x94d   :  { %v662_v3 = vrot.slane %v657_v2, 5  ;;  %v663_v4 = vrot.slane %v657_v2, 6  ;;  %v1627_v5 = vpop.f32.mrb[5].mxu0 }
 0x94f   :  { %v666_v6 = vadd.f32 %v662_v3, %v2008_v15  ;;  %v667_v8 = vadd.f32 %v663_v4, %v2006_v11 }
 0x951   :  { %1764 = vtanh.f32 %v666_v6  ;;  %v1539_v12 = vmul.f32 -1.442695, %v666_v6  ;;  %v1540_v13 = vmul.f32 -1.442695, %v667_v8 }
 0x952   :  { %1766 = vtanh.f32 %v667_v8 }
 0x953   :  { %1768 = vpow2.f32 %v1539_v12 }
 0x954   :  { %1770 = vpow2.f32 %v1540_v13 }
 0x95b   :  { %v1765_v9 = vpop.eup %1764 }
 0x95c   :  { %v1767_v10 = vpop.eup %1766  ;;  %692 = vrot.lane.b32.xlu1 %v1765_v9, %s1899_s12 }
 0x95d   :  { %694 = vrot.lane.b32.xlu0 %v1767_v10, %s1899_s12  ;;  %v1769_v0 = vpop.eup %1768 }
 0x95e   :  { %v1771_v14 = vpop.eup %1770  ;;  %v674_v16 = vadd.f32 1.0, %v1769_v0 }
 0x95f   :  { %v675_v17 = vadd.f32 1.0, %v1771_v14 }
 0x960   :  { %1772 = vrcp.f32 %v674_v16 }
 0x961   :  { %1774 = vrcp.f32 %v675_v17 }
 0x96a   :  { %v1773_v18 = vpop.eup %1772 }
 0x96b   :  { %v1775_v22 = vpop.eup %1774  ;;  %v688_v28 = vmul.f32 %v1773_v18, %v684_v26 }
 0x96c   :  { %v689_v29 = vmul.f32 %v1775_v22, %v685_v27 }
 0x9ce   :  { %v693_v21 = vpop.permute.xlu1 %692 }
 0x9cf   :  { %v695_v23 = vpop.permute.xlu0 %694  ;;  %v698_v24 = vmul.f32 %v1773_v18, %v693_v21 }
 0x9d0   :  { %v699_v25 = vmul.f32 %v1775_v22, %v695_v23 }
 0x9d1   :  { %702 = vrot.lane.b32.xlu1 %v698_v24, %s1900_s3 }
 0x9d2   :  { %704 = vrot.lane.b32.xlu0 %v699_v25, %s1900_s3 }
 0xa43   :  { %v703_v30 = vpop.permute.xlu1 %702 }
 0xa44   :  { %v705_v31 = vpop.permute.xlu0 %704  ;;  %v708_v32 = vadd.f32 %v703_v30, %v688_v28 }
 0xa45   :  { %v709_v33 = vadd.f32 %v705_v31, %v689_v29 }
 0xa46   :  { %1776 = vtanh.f32 %v708_v32  ;;  %v833_v6 = vrot.slane %v708_v32, 7 }
 0xa47   :  { %1778 = vtanh.f32 %v709_v33  ;;  %v834_v8 = vrot.slane %v709_v33, 7 }
 0xa50   :  { %v1777_v34 = vpop.eup %1776 }
 0xa51   :  { %v1779_v35 = vpop.eup %1778  ;;  %714 = vrot.lane.b32.xlu1 %v1777_v34, %s1901_s13 }
 0xa52   :  { %716 = vrot.lane.b32.xlu0 %v1779_v35, %s1901_s13 }
 0xac3   :  { %v715_v36 = vpop.permute.xlu1 %714 }
 0xac4   :  { %v717_v37 = vpop.permute.xlu0 %716  ;;  %v2081_v38 = vmul.f32 %v1773_v18, %v715_v36 }
 0xac5   :  { %v2083_v39 = vmul.f32 %v1775_v22, %v717_v37 }
 0xac6   :  { %v733_v40 = vrot.slane %v2081_v38, 3 }
 0xac7   :  { %v734_v42 = vrot.slane %v2083_v39, 2 }
 0xac9   :  { %v735_v43 = vsel %vm289_vm2, %v734_v42, %v733_v40 }
 0xaca   :  { %736 = vrot.lane.b32.xlu1 %v735_v43, %s1902_s14 }
 0xb3c   :  { %v737_v45 = vpop.permute.xlu1 %736 }
 0xb3d   :  { %1633 = vmatmul.mubr.msk.f32.vlgmr.msra.gmra.mrb[4].mxu1 %vm149_vm3, %v737_v45 }
 0xb3e   :  { %1690 = vmatpush3.bf16.msra.mxu1 %v1989_v7  ;;  %1646 = vmatprep.mubr.msk.f32.mxu1 %vm1897_vm0, %v1898_v1 }
 0xc10   :  { %v806_v46 = vpop.f32.mrb[4].mxu1 }
 0xc11   :  { %v811_v47 = vrot.slane %v806_v46, 4  ;;  %v812_v48 = vrot.slane %v806_v46, 5  ;;  %v1634_v49 = vpop.f32.mrb[5].mxu1 }
 0xc13   :  { %v815_v50 = vadd.f32 %v811_v47, %v2008_v15  ;;  %v816_v51 = vadd.f32 %v812_v48, %v2006_v11 }
 0xc15   :  { %1780 = vtanh.f32 %v815_v50  ;;  %v1542_v54 = vmul.f32 -1.442695, %v815_v50  ;;  %v1543_v55 = vmul.f32 -1.442695, %v816_v51 }
 0xc16   :  { %1782 = vtanh.f32 %v816_v51 }
 0xc17   :  { %1784 = vpow2.f32 %v1542_v54 }
 0xc18   :  { %1786 = vpow2.f32 %v1543_v55 }
 0xc1f   :  { %v1781_v52 = vpop.eup %1780 }
 0xc20   :  { %v1783_v53 = vpop.eup %1782  ;;  %841 = vrot.lane.b32.xlu0 %v1781_v52, %s1899_s12 }
 0xc21   :  { %843 = vrot.lane.b32.xlu1 %v1783_v53, %s1899_s12  ;;  %v1785_v56 = vpop.eup %1784 }
 0xc22   :  { %v1787_v57 = vpop.eup %1786  ;;  %v823_v60 = vadd.f32 1.0, %v1785_v56 }
 0xc23   :  { %v824_v61 = vadd.f32 1.0, %v1787_v57 }
 0xc24   :  { %1788 = vrcp.f32 %v823_v60 }
 0xc25   :  { %1790 = vrcp.f32 %v824_v61 }
 0xc2e   :  { %v1789_v62 = vpop.eup %1788 }
 0xc2f   :  { %v1791_v2 = vpop.eup %1790  ;;  %v837_v9 = vmul.f32 %v1789_v62, %v833_v6 }
 0xc30   :  { %v838_v10 = vmul.f32 %v1791_v2, %v834_v8 }
 0xc92   :  { %v842_v63 = vpop.permute.xlu0 %841 }
 0xc93   :  { %v844_v3 = vpop.permute.xlu1 %843  ;;  %v847_v4 = vmul.f32 %v1789_v62, %v842_v63 }
 0xc94   :  { %v848_v5 = vmul.f32 %v1791_v2, %v844_v3 }
 0xc95   :  { %851 = vrot.lane.b32.xlu0 %v847_v4, %s1900_s3 }
 0xc96   :  { %853 = vrot.lane.b32.xlu1 %v848_v5, %s1900_s3 }
 0xd07   :  { %v852_v12 = vpop.permute.xlu0 %851 }
 0xd08   :  { %v854_v13 = vpop.permute.xlu1 %853  ;;  %v857_v0 = vadd.f32 %v852_v12, %v837_v9 }
 0xd09   :  { %v858_v14 = vadd.f32 %v854_v13, %v838_v10 }
 0xd0a   :  { %1792 = vtanh.f32 %v857_v0  ;;  %v982_v50 = vrot.slane %v857_v0, 7 }
 0xd0b   :  { %1794 = vtanh.f32 %v858_v14  ;;  %v983_v51 = vrot.slane %v858_v14, 7 }
 0xd14   :  { %v1793_v16 = vpop.eup %1792 }
 0xd15   :  { %v1795_v17 = vpop.eup %1794  ;;  %863 = vrot.lane.b32.xlu0 %v1793_v16, %s1901_s13 }
 0xd16   :  { %865 = vrot.lane.b32.xlu1 %v1795_v17, %s1901_s13 }
 0xd87   :  { %v864_v18 = vpop.permute.xlu0 %863 }
 0xd88   :  { %v866_v21 = vpop.permute.xlu1 %865  ;;  %v2101_v22 = vmul.f32 %v1789_v62, %v864_v18 }
 0xd89   :  { %v2103_v23 = vmul.f32 %v1791_v2, %v866_v21 }
 0xd8a   :  { %v882_v24 = vrot.slane %v2101_v22, 4 }
 0xd8b   :  { %v883_v25 = vrot.slane %v2103_v23, 3 }
 0xd8d   :  { %v884_v26 = vsel %vm289_vm2, %v883_v25, %v882_v24 }
 0xd8e   :  { %885 = vrot.lane.b32.xlu0 %v884_v26, %s1902_s14 }
 0xe00   :  { %v886_v27 = vpop.permute.xlu0 %885 }
 0xe01   :  { %1640 = vmatmul.mubr.msk.f32.vlgmr.msra.gmra.mrb[6].mxu0 %vm149_vm3, %v886_v27 }
 0xe02   :  { %1693 = vmatpush3.bf16.msra.mxu0 %v1989_v7  ;;  %1653 = vmatprep.mubr.msk.f32.mxu0 %vm1897_vm0, %v1898_v1  ;;  %vm1518_vm0 = vcmask 15360  }
 0xed4   :  { %v955_v28 = vpop.f32.mrb[6].mxu0 }
 0xed5   :  { %v960_v29 = vrot.slane %v955_v28, 3  ;;  %v961_v30 = vrot.slane %v955_v28, 4  ;;  %v1641_v31 = vpop.f32.mrb[7].mxu0 }
 0xed7   :  { %v964_v32 = vadd.f32 %v960_v29, %v2008_v15  ;;  %v965_v33 = vadd.f32 %v961_v30, %v2006_v11 }
 0xed9   :  { %1796 = vtanh.f32 %v964_v32  ;;  %v1545_v7 = vmul.f32 -1.442695, %v964_v32  ;;  %v1546_v36 = vmul.f32 -1.442695, %v965_v33 }
 0xeda   :  { %1798 = vtanh.f32 %v965_v33 }
 0xedb   :  { %1800 = vpow2.f32 %v1545_v7 }
 0xedc   :  { %1802 = vpow2.f32 %v1546_v36 }
 0xee3   :  { %v1797_v34 = vpop.eup %1796 }
 0xee4   :  { %v1799_v35 = vpop.eup %1798  ;;  %990 = vrot.lane.b32.xlu1 %v1797_v34, %s1899_s12 }
 0xee5   :  { %992 = vrot.lane.b32.xlu0 %v1799_v35, %s1899_s12  ;;  %v1801_v1 = vpop.eup %1800 }
 0xee6   :  { %v1803_v37 = vpop.eup %1802  ;;  %v972_v40 = vadd.f32 1.0, %v1801_v1 }
 0xee7   :  { %v973_v42 = vadd.f32 1.0, %v1803_v37 }
 0xee8   :  { %1804 = vrcp.f32 %v972_v40 }
 0xee9   :  { %1806 = vrcp.f32 %v973_v42 }
 0xef2   :  { %v1805_v43 = vpop.eup %1804 }
 0xef3   :  { %v1807_v46 = vpop.eup %1806  ;;  %v986_v52 = vmul.f32 %v1805_v43, %v982_v50 }
 0xef4   :  { %v987_v53 = vmul.f32 %v1807_v46, %v983_v51 }
 0xf56   :  { %v991_v45 = vpop.permute.xlu1 %990 }
 0xf57   :  { %v993_v47 = vpop.permute.xlu0 %992  ;;  %v996_v48 = vmul.f32 %v1805_v43, %v991_v45 }
 0xf58   :  { %v997_v49 = vmul.f32 %v1807_v46, %v993_v47 }
 0xf59   :  { %1000 = vrot.lane.b32.xlu1 %v996_v48, %s1900_s3 }
 0xf5a   :  { %1002 = vrot.lane.b32.xlu0 %v997_v49, %s1900_s3 }
 0xfcb   :  { %v1001_v54 = vpop.permute.xlu1 %1000 }
 0xfcc   :  { %v1003_v55 = vpop.permute.xlu0 %1002  ;;  %v1006_v56 = vadd.f32 %v1001_v54, %v986_v52 }
 0xfcd   :  { %v1007_v57 = vadd.f32 %v1003_v55, %v987_v53 }
 0xfce   :  { %1808 = vtanh.f32 %v1006_v56  ;;  %v1131_v34 = vrot.slane %v1006_v56, 7 }
 0xfcf   :  { %1810 = vtanh.f32 %v1007_v57  ;;  %v1132_v35 = vrot.slane %v1007_v57, 7 }
 0xfd8   :  { %v1809_v60 = vpop.eup %1808 }
 0xfd9   :  { %v1811_v61 = vpop.eup %1810  ;;  %1012 = vrot.lane.b32.xlu1 %v1809_v60, %s1901_s13 }
 0xfda   :  { %1014 = vrot.lane.b32.xlu0 %v1811_v61, %s1901_s13 }
0x104b   :  { %v1013_v62 = vpop.permute.xlu1 %1012 }
0x104c   :  { %v1015_v63 = vpop.permute.xlu0 %1014  ;;  %v2121_v2 = vmul.f32 %v1805_v43, %v1013_v62 }
0x104d   :  { %v2123_v3 = vmul.f32 %v1807_v46, %v1015_v63 }
0x104e   :  { %v1031_v4 = vrot.slane %v2121_v2, 5 }
0x104f   :  { %v1032_v5 = vrot.slane %v2123_v3, 4 }
0x1051   :  { %v1033_v6 = vsel %vm289_vm2, %v1032_v5, %v1031_v4 }
0x1052   :  { %1034 = vrot.lane.b32.xlu1 %v1033_v6, %s1902_s14 }
0x10c4   :  { %v1035_v8 = vpop.permute.xlu1 %1034 }
0x10c5   :  { %1647 = vmatmul.mubr.msk.f32.vlgmr.msra.gmra.mrb[6].mxu1 %vm149_vm3, %v1035_v8 }
0x1198   :  { %v1104_v9 = vpop.f32.mrb[6].mxu1 }
0x1199   :  { %v1109_v10 = vrot.slane %v1104_v9, 2  ;;  %v1110_v12 = vrot.slane %v1104_v9, 3  ;;  %v1648_v13 = vpop.f32.mrb[7].mxu1 }
0x119b   :  { %v1113_v0 = vadd.f32 %v1109_v10, %v2008_v15  ;;  %v1114_v14 = vadd.f32 %v1110_v12, %v2006_v11 }
0x119d   :  { %1812 = vtanh.f32 %v1113_v0  ;;  %v1548_v18 = vmul.f32 -1.442695, %v1113_v0  ;;  %v1549_v21 = vmul.f32 -1.442695, %v1114_v14 }
0x119e   :  { %1814 = vtanh.f32 %v1114_v14 }
0x119f   :  { %1816 = vpow2.f32 %v1548_v18 }
0x11a0   :  { %1818 = vpow2.f32 %v1549_v21 }
0x11a7   :  { %v1813_v16 = vpop.eup %1812 }
0x11a8   :  { %v1815_v17 = vpop.eup %1814  ;;  %1139 = vrot.lane.b32.xlu0 %v1813_v16, %s1899_s12 }
0x11a9   :  { %1141 = vrot.lane.b32.xlu1 %v1815_v17, %s1899_s12  ;;  %v1817_v24 = vpop.eup %1816 }
0x11aa   :  { %v1819_v25 = vpop.eup %1818  ;;  %v1121_v26 = vadd.f32 1.0, %v1817_v24 }
0x11ab   :  { %v1122_v27 = vadd.f32 1.0, %v1819_v25 }
0x11ac   :  { %1820 = vrcp.f32 %v1121_v26 }
0x11ad   :  { %1822 = vrcp.f32 %v1122_v27 }
0x11b6   :  { %v1821_v28 = vpop.eup %1820 }
0x11b7   :  { %v1823_v30 = vpop.eup %1822  ;;  %v1135_v7 = vmul.f32 %v1821_v28, %v1131_v34 }
0x11b8   :  { %v1136_v36 = vmul.f32 %v1823_v30, %v1132_v35 }
0x121a   :  { %v1140_v29 = vpop.permute.xlu0 %1139 }
0x121b   :  { %v1142_v31 = vpop.permute.xlu1 %1141  ;;  %v1145_v32 = vmul.f32 %v1821_v28, %v1140_v29 }
0x121c   :  { %v1146_v33 = vmul.f32 %v1823_v30, %v1142_v31 }
0x121d   :  { %1149 = vrot.lane.b32.xlu0 %v1145_v32, %s1900_s3 }
0x121e   :  { %1151 = vrot.lane.b32.xlu1 %v1146_v33, %s1900_s3 }
0x128f   :  { %v1150_v1 = vpop.permute.xlu0 %1149 }
0x1290   :  { %v1152_v37 = vpop.permute.xlu1 %1151  ;;  %v1155_v40 = vadd.f32 %v1150_v1, %v1135_v7 }
0x1291   :  { %v1156_v42 = vadd.f32 %v1152_v37, %v1136_v36 }
0x1292   :  { %1824 = vtanh.f32 %v1155_v40  ;;  %v1280_v16 = vrot.slane %v1155_v40, 7 }
0x1293   :  { %1826 = vtanh.f32 %v1156_v42  ;;  %v1281_v17 = vrot.slane %v1156_v42, 7 }
0x129c   :  { %v1825_v43 = vpop.eup %1824 }
0x129d   :  { %v1827_v45 = vpop.eup %1826  ;;  %1161 = vrot.lane.b32.xlu0 %v1825_v43, %s1901_s13 }
0x129e   :  { %1163 = vrot.lane.b32.xlu1 %v1827_v45, %s1901_s13  ;;  %v1423_v45 = vld [vmem:[%s2227_s6] sm:$0xff] }
0x130f   :  { %v1162_v46 = vpop.permute.xlu0 %1161 }
0x1310   :  { %v1164_v47 = vpop.permute.xlu1 %1163  ;;  %v1167_v48 = vmul.f32 %v1821_v28, %v1162_v46  ;;  %v1424_v46 = vld [vmem:[%s2227_s6 + $0x8] sm:$0x3] }
0x1311   :  { %v2138_v49 = vmul.f32 %v1823_v30, %v1164_v47  ;;  %v1698_v47 = vpack.c.bf16 %v1424_v46, %v1423_v45 }
0x1312   :  { %v1180_v50 = vrot.slane %v1167_v48, 6 }
0x1313   :  { %v1181_v51 = vrot.slane %v2138_v49, 5  ;;  %1700 = vmatprep.subr.msk.bf16.mxu0 %vm1699_vm14, %v1698_v47 }
0x1315   :  { %v1182_v52 = vsel %vm289_vm2, %v1181_v51, %v1180_v50 }
0x1316   :  { %1183 = vrot.lane.b32.xlu0 %v1182_v52, %s1902_s14 }
0x1388   :  { %v1184_v53 = vpop.permute.xlu0 %1183 }
0x1389   :  { %1654 = vmatmul.mubr.msk.f32.vlgmr.msra.gmra.mrb[8].mxu0 %vm149_vm3, %v1184_v53 }
0x138a   :  { %1703 = vmatpush3.bf16.msk.msra.mxu0 %vm1699_vm14, %v1698_v47 }
0x145c   :  { %v1253_v54 = vpop.f32.mrb[8].mxu0 }
0x145d   :  { %v1258_v55 = vrot.slane %v1253_v54, 1  ;;  %v1259_v56 = vrot.slane %v1253_v54, 2  ;;  %v1655_v57 = vpop.f32.mrb[9].mxu0 }
0x145f   :  { %v1262_v60 = vadd.f32 %v1258_v55, %v2008_v15  ;;  %v1263_v61 = vadd.f32 %v1259_v56, %v2006_v11  ;;  %v1556_v55 = vld [vmem:[%s2228_s7] ss:$0 sm:$0xff] }
0x1461   :  { %1828 = vtanh.f32 %v1262_v60  ;;  %v1551_v4 = vmul.f32 -1.442695, %v1262_v60  ;;  %v1552_v5 = vmul.f32 -1.442695, %v1263_v61 }
0x1462   :  { %1830 = vtanh.f32 %v1263_v61 }
0x1463   :  { %1832 = vpow2.f32 %v1551_v4 }
0x1464   :  { %1834 = vpow2.f32 %v1552_v5 }
0x146b   :  { %v1829_v62 = vpop.eup %1828 }
0x146c   :  { %v1831_v63 = vpop.eup %1830  ;;  %1288 = vrot.lane.b32.xlu1 %v1829_v62, %s1899_s12 }
0x146d   :  { %1290 = vrot.lane.b32.xlu0 %v1831_v63, %s1899_s12  ;;  %v1833_v6 = vpop.eup %1832 }
0x146e   :  { %v1835_v8 = vpop.eup %1834  ;;  %v1270_v9 = vadd.f32 1.0, %v1833_v6 }
0x146f   :  { %v1271_v10 = vadd.f32 1.0, %v1835_v8 }
0x1470   :  { %1836 = vrcp.f32 %v1270_v9 }
0x1471   :  { %1838 = vrcp.f32 %v1271_v10 }
0x147a   :  { %v1837_v15 = vpop.eup %1836 }
0x147b   :  { %v1839_v12 = vpop.eup %1838  ;;  %v1284_v18 = vmul.f32 %v1837_v15, %v1280_v16 }
0x147c   :  { %v1285_v21 = vmul.f32 %v1839_v12, %v1281_v17 }
0x14de   :  { %v1289_v11 = vpop.permute.xlu1 %1288 }
0x14df   :  { %v1291_v13 = vpop.permute.xlu0 %1290  ;;  %v1294_v0 = vmul.f32 %v1837_v15, %v1289_v11 }
0x14e0   :  { %v1295_v14 = vmul.f32 %v1839_v12, %v1291_v13 }
0x14e1   :  { %1298 = vrot.lane.b32.xlu1 %v1294_v0, %s1900_s3 }
0x14e2   :  { %1300 = vrot.lane.b32.xlu0 %v1295_v14, %s1900_s3 }
0x1553   :  { %v1299_v24 = vpop.permute.xlu1 %1298 }
0x1554   :  { %v1301_v25 = vpop.permute.xlu0 %1300  ;;  %v1304_v26 = vadd.f32 %v1299_v24, %v1284_v18 }
0x1555   :  { %v1305_v27 = vadd.f32 %v1301_v25, %v1285_v21 }
0x1556   :  { %1840 = vtanh.f32 %v1304_v26 }
0x1557   :  { %1842 = vtanh.f32 %v1305_v27 }
0x1560   :  { %v1841_v28 = vpop.eup %1840 }
0x1561   :  { %v1843_v29 = vpop.eup %1842  ;;  %1310 = vrot.lane.b32.xlu1 %v1841_v28, %s1901_s13 }
0x1562   :  { %1312 = vrot.lane.b32.xlu0 %v1843_v29, %s1901_s13 }
0x1565   :  { %279 = vrot.lane.b32.xlu1 %v2021_v44, %s1902_s14  ;;  %v1331_v44 = vld [vmem:[%s2225_s4] sm:$0xff] }
0x1566   :  { %427 = vrot.lane.b32.xlu0 %v2039_v19, %s1902_s14 }
0x1569   :  { %575 = vrot.lane.b32.xlu1 %v2060_v58, %s1902_s14 }
0x156a   :  { %724 = vrot.lane.b32.xlu0 %v2081_v38, %s1902_s14 }
0x156d   :  { %873 = vrot.lane.b32.xlu1 %v2101_v22, %s1902_s14 }
0x156e   :  { %1022 = vrot.lane.b32.xlu0 %v2121_v2, %s1902_s14 }
0x1571   :  { %1171 = vrot.lane.b32.xlu1 %v1167_v48, %s1902_s14  ;;  %v1553_v48 = vld [vmem:[%s2226_s5] ss:$0 sm:$0xff] }
0x1572   :  { %429 = vrot.lane.b32.xlu0 %v2041_v20, %s1902_s14 }
0x1575   :  { %281 = vrot.lane.b32.xlu1 %v2018_v41, %s1902_s14  ;;  %v1332_v41 = vld [vmem:[%s2225_s4 + $0x8] sm:$0xff] }
0x1576   :  { %726 = vrot.lane.b32.xlu0 %v2083_v39, %s1902_s14  ;;  %v1694_v19 = vpack.c.bf16 %v1332_v41, %v1331_v44 }
0x1578   :  { %1695 = vmatprep.subr.bf16.mxu1 %v1694_v19 }
0x1579   :  { %577 = vrot.lane.b32.xlu1 %v2062_v59, %s1902_s14  ;;  %1697 = vmatpush3.bf16.msra.mxu1 %v1694_v19 }
0x157a   :  { %1024 = vrot.lane.b32.xlu0 %v2123_v3, %s1902_s14 }
0x157d   :  { %875 = vrot.lane.b32.xlu1 %v2103_v23, %s1902_s14 }
0x1581   :  { %1173 = vrot.lane.b32.xlu1 %v2138_v49, %s1902_s14 }
0x15d3   :  { %v1311_v20 = vpop.permute.xlu1 %1310 }
0x15d4   :  { %v1313_v58 = vpop.permute.xlu0 %1312  ;;  %v1316_v59 = vmul.f32 %v1837_v15, %v1311_v20 }
0x15d5   :  { %v1317_v39 = vmul.f32 %v1839_v12, %v1313_v58 }
0x15d6   :  { %1320 = vrot.lane.b32.xlu0 %v1316_v59, %s1902_s14 }
0x15d7   :  { %v280_v38 = vpop.permute.xlu1 %279 }
0x15d8   :  { %v428_v22 = vpop.permute.xlu0 %427  ;;  %286 = vst.msk [vmem:[#allocation2] sm:$0x1] %vm285_vm4, %v280_v38 }
0x15d9   :  { %434 = vst.msk [vmem:[#allocation2] sm:$0x2] %vm433_vm5, %v428_v22 }
0x15da   :  { %1322 = vrot.lane.b32.xlu0 %v1317_v39, %s1902_s14 }
0x15db   :  { %v576_v23 = vpop.permute.xlu1 %575 }
0x15dc   :  { %v725_v2 = vpop.permute.xlu0 %724  ;;  %582 = vst.msk [vmem:[#allocation2] sm:$0x4] %vm581_vm6, %v576_v23 }
0x15dd   :  { %731 = vst.msk [vmem:[#allocation2] sm:$0x8] %vm730_vm7, %v725_v2 }
0x15df   :  { %v874_v3 = vpop.permute.xlu1 %873 }
0x15e0   :  { %v1023_v30 = vpop.permute.xlu0 %1022  ;;  %880 = vst.msk [vmem:[#allocation2] sm:$0x10] %vm879_vm8, %v874_v3 }
0x15e1   :  { %1029 = vst.msk [vmem:[#allocation2] sm:$0x20] %vm1028_vm9, %v1023_v30 }
0x15e3   :  { %v1172_v31 = vpop.permute.xlu1 %1171 }
0x15e4   :  { %v430_v32 = vpop.permute.xlu0 %429  ;;  %1178 = vst.msk [vmem:[#allocation2] sm:$0x40] %vm1177_vm10, %v1172_v31 }
0x15e5   :  { %435 = vst.msk [vmem:[#allocation2 + $0x8] sm:$0x2] %vm433_vm5, %v430_v32 }
0x15e7   :  { %v282_v33 = vpop.permute.xlu1 %281 }
0x15e8   :  { %v727_v34 = vpop.permute.xlu0 %726  ;;  %287 = vst.msk [vmem:[#allocation2 + $0x8] sm:$0x1] %vm285_vm4, %v282_v33 }
0x15e9   :  { %732 = vst.msk [vmem:[#allocation2 + $0x8] sm:$0x8] %vm730_vm7, %v727_v34 }
0x15eb   :  { %v578_v35 = vpop.permute.xlu1 %577 }
0x15ec   :  { %v1025_v7 = vpop.permute.xlu0 %1024  ;;  %583 = vst.msk [vmem:[#allocation2 + $0x8] sm:$0x4] %vm581_vm6, %v578_v35 }
0x15ed   :  { %1030 = vst.msk [vmem:[#allocation2 + $0x8] sm:$0x20] %vm1028_vm9, %v1025_v7 }
0x15ef   :  { %v876_v36 = vpop.permute.xlu1 %875 }
0x15f0   :  { %881 = vst.msk [vmem:[#allocation2 + $0x8] sm:$0x10] %vm879_vm8, %v876_v36 }
0x15f3   :  { %v1174_v1 = vpop.permute.xlu1 %1173 }
0x15f4   :  { %1179 = vst.msk [vmem:[#allocation2 + $0x8] sm:$0x40] %vm1177_vm10, %v1174_v1 }
0x1648   :  { %v1321_v37 = vpop.permute.xlu0 %1320 }
0x1649   :  { %1327 = vst.msk [vmem:[#allocation2] sm:$0x80] %vm1326_vm11, %v1321_v37 }
0x164c   :  { %v1323_v40 = vpop.permute.xlu0 %1322 }
0x164d   :  { %1328 = vst.msk [vmem:[#allocation2 + $0x8] sm:$0x80] %vm1326_vm11, %v1323_v40 }
0x1650   :  { %v1329_v42 = vld [vmem:[#allocation2] sm:$0xff] }
0x1651   :  { %1660 = vmatprep.mubr.msk.f32.mxu1 %vm149_vm3, %v1329_v42 }
0x1654   :  { %v1330_v43 = vld [vmem:[#allocation2 + $0x8] sm:$0xff] }
0x1655   :  { %1661 = vmatmul.mubr.msk.f32.vlgmr.msra.gmra.mrb[8].mxu1 %vm149_vm3, %v1330_v43 }
0x1728   :  { %v1662_v49 = vpop.f32.mrb[8].mxu1 }
0x1729   :  { %v1418_v50 = vadd.f32 %v1662_v49, %v1553_v48  ;;  %v1412_v51 = vpop.f32.mrb[9].mxu1 }
0x172a   :  { %v1413_v52 = vadd.f32 %v1553_v48, %v1412_v51 }
0x172b   :  { %v1422_v54 = vmax.f32 %v1418_v50, 0.0 }
0x172c   :  { %v1421_v53 = vmax.f32 %v1413_v52, 0.0 }
0x172e   :  { %1667 = vmatprep.mubr.msk.f32.mxu0 %vm1432_vm15, %v1421_v53 }
0x172f   :  { %1668 = vmatmul.mubr.msk.f32.vlgmr.msra.gmra.mrb[10].mxu0 %vm1432_vm15, %v1422_v54 }
0x1802   :  { %v1669_v56 = vpop.f32.mrb[10].mxu0 }
0x1803   :  { %v1515_v57 = vadd.f32 %v1669_v56, %v1556_v55  ;;  %v1509_v60 = vpop.f32.mrb[11].mxu0 }
0x1804   :  { %v1510_v61 = vadd.f32 %v1556_v55, %v1509_v60 }
0x1805   :  { %1520 = vst.msk [vmem:[%s2229_s8 + $0x8] sm:$0xff] %vm1518_vm0, %v1515_v57 }
0x1806   :  { %1519 = vst.msk [vmem:[%s2229_s8] sm:$0xff] %vm1518_vm0, %v1510_v61 }
0x1807   :  { %1525 = vsyncpa [#allocation4], 1 }
0x1808   :  { %1526 = vsyncpa [#allocation6], 1 }

</bundles_post_ra>
